<compile_context>
chip_gen: v6e
topology: v6e:2x2x1
jax: 0.10.0
libtpu: 0.0.40
codegen_flags: <defaults>
</compile_context>

<pallas_src>
import functools

import jax
import jax.numpy as jnp
from jax import lax
from jax.experimental import pallas as pl
from jax.experimental.pallas import tpu as pltpu


def _round_up(x, m):
    return ((x + m - 1) // m) * m


def _ffn_kernel(x_ref, w1_ref, w2_ref, g_ref, b_ref, o_ref, acc_ref, *, eps):
    f = pl.program_id(1)

    @pl.when(f == 0)
    def _init():
        acc_ref[...] = jnp.zeros_like(acc_ref)

    x = x_ref[...]                                     # [tm, d_model]
    # relu(x @ W1[:, f-tile]) -> [tm, tf], accumulated in f32 on the MXU
    h = jnp.maximum(
        jnp.dot(x, w1_ref[...], preferred_element_type=jnp.float32), 0.0
    )
    # partial y += h @ W2[f-tile, :]
    acc_ref[...] += jnp.dot(
        h.astype(w2_ref.dtype), w2_ref[...], preferred_element_type=jnp.float32
    )

    @pl.when(f == pl.num_programs(1) - 1)
    def _finalize():
        y = acc_ref[...] + x.astype(jnp.float32)       # residual add (in VMEM)
        mean = jnp.mean(y, axis=-1, keepdims=True)
        d = y - mean
        var = jnp.mean(d * d, axis=-1, keepdims=True)
        inv = lax.rsqrt(var + eps)                     # EUP slot
        gamma = g_ref[...].astype(jnp.float32)         # [1, d_model]
        beta = b_ref[...].astype(jnp.float32)          # [1, d_model]
        o_ref[...] = (d * inv * gamma + beta).astype(o_ref.dtype)


def _estimate_vmem(tm, tf, d_model, in_bytes, out_bytes):
    """Rough per-kernel VMEM footprint: double-buffered I/O + resident acc."""
    x_t = tm * d_model * in_bytes
    w1_t = d_model * tf * in_bytes
    w2_t = tf * d_model * in_bytes
    out_t = tm * d_model * out_bytes
    gb_t = 2 * d_model * 4
    acc_t = tm * d_model * 4
    return 2 * (x_t + w1_t + w2_t + out_t + gb_t) + acc_t


def _choose_tiles(n_rows, d_model, d_ff, in_bytes, out_bytes,
                  max_rows=512, max_ff=1024, budget=40 * 1024 * 1024):
    """Pick (tm, tf) as large as the VMEM budget allows."""
    tm = min(max_rows, _round_up(n_rows, 8))
    tf = d_ff if d_ff <= max_ff else max_ff            # full d_ff or 128-multiple
    while _estimate_vmem(tm, tf, d_model, in_bytes, out_bytes) > budget:
        if tf > 256 and tf != d_ff:
            tf //= 2
        elif tm > 64:
            tm = max(64, tm // 2)
        else:
            break
    return tm, tf


def poswise_feed_forward(inputs, w1, w2, gamma, beta, *, eps=1e-6):
    """inputs: [B, S, d_model], w1: [d_model, d_ff], w2: [d_ff, d_model],
    gamma/beta: [d_model].  Returns [B, S, d_model]."""
    B, S, d_model = inputs.shape
    d_ff = w1.shape[1]
    N = B * S

    in_bytes = jnp.dtype(inputs.dtype).itemsize
    out_bytes = in_bytes
    tm, tf = _choose_tiles(N, d_model, d_ff, in_bytes, out_bytes)

    x = inputs.reshape(N, d_model)

    # --- row tiling (parallel axis) ----------------------------------------
    n_pad = _round_up(N, tm)
    if n_pad != N:
        x = jnp.pad(x, ((0, n_pad - N), (0, 0)))

    # --- d_ff tiling (reduction axis, placed last) --------------------------
    if tf == d_ff:
        f_pad = d_ff                   # full dim: no (8,128) constraint
    else:
        f_pad = _round_up(d_ff, tf)
        if f_pad != d_ff:
            # zero-padding the hidden dim is exact: relu(0)=0 contributes 0.
            w1 = jnp.pad(w1, ((0, 0), (0, f_pad - d_ff)))
            w2 = jnp.pad(w2, ((0, f_pad - d_ff), (0, 0)))

    g2 = gamma.reshape(1, d_model)
    b2 = beta.reshape(1, d_model)

    grid = (n_pad // tm, f_pad // tf)
    kernel = functools.partial(_ffn_kernel, eps=eps)

    out = pl.pallas_call(
        kernel,
        out_shape=jax.ShapeDtypeStruct((n_pad, d_model), inputs.dtype),
        grid_spec=pltpu.PrefetchScalarGridSpec(
            num_scalar_prefetch=0,
            grid=grid,
            in_specs=[
                pl.BlockSpec((tm, d_model), lambda i, f: (i, 0)),   # x (resident across f)
                pl.BlockSpec((d_model, tf), lambda i, f: (0, f)),   # W1 tile
                pl.BlockSpec((tf, d_model), lambda i, f: (f, 0)),   # W2 tile
                pl.BlockSpec((1, d_model), lambda i, f: (0, 0)),    # gamma (resident)
                pl.BlockSpec((1, d_model), lambda i, f: (0, 0)),    # beta (resident)
            ],
            out_specs=pl.BlockSpec((tm, d_model), lambda i, f: (i, 0)),
            scratch_shapes=[pltpu.VMEM((tm, d_model), jnp.float32)],
        ),
        compiler_params=pltpu.CompilerParams(
            dimension_semantics=("parallel", "arbitrary"),
            vmem_limit_bytes=56 * 1024 * 1024,
        ),
    )(x, w1, w2, g2, b2)

    return out[:N].reshape(B, S, d_model)


def _reference(inputs, w1, w2, gamma, beta, eps=1e-6):
    h = jnp.maximum(inputs @ w1, 0.0)
    y = h @ w2 + inputs
    mean = jnp.mean(y, axis=-1, keepdims=True)
    var = jnp.mean((y - mean) ** 2, axis=-1, keepdims=True)
    return (y - mean) / jnp.sqrt(var + eps) * gamma + beta


if __name__ == "__main__":
    B, S, d_model, d_ff = 2, 8, 32, 128

    key = jax.random.PRNGKey(0)
    kx, k1, k2, kg, kb = jax.random.split(key, 5)

    x = jax.random.normal(kx, (B, S, d_model), dtype=jnp.float32)
    w1 = jax.random.normal(k1, (d_model, d_ff), dtype=jnp.float32) * 0.1
    w2 = jax.random.normal(k2, (d_ff, d_model), dtype=jnp.float32) * 0.1
    gamma = 1.0 + 0.1 * jax.random.normal(kg, (d_model,), dtype=jnp.float32)
    beta = 0.1 * jax.random.normal(kb, (d_model,), dtype=jnp.float32)

    out = poswise_feed_forward(x, w1, w2, gamma, beta, eps=1e-6)
    jax.block_until_ready(out)

    ref = _reference(x, w1, w2, gamma, beta, eps=1e-6)
    assert out.shape == ref.shape
    assert jnp.allclose(out, ref, atol=1e-4, rtol=1e-4), (
        float(jnp.max(jnp.abs(out - ref)))
    )

    print("KERNEL_OK")
</pallas_src>

<mosaic_0001>
module attributes {stable_mosaic.version = 11 : i64} {
  func.func @_ffn_kernel(%arg0: i32, %arg1: i32, %arg2: memref<16x32xf32, #tpu.memory_space<vmem>>, %arg3: memref<32x128xf32, #tpu.memory_space<vmem>>, %arg4: memref<128x32xf32, #tpu.memory_space<vmem>>, %arg5: memref<1x32xf32, #tpu.memory_space<vmem>>, %arg6: memref<1x32xf32, #tpu.memory_space<vmem>>, %arg7: memref<16x32xf32, #tpu.memory_space<vmem>>, %arg8: memref<16x32xf32, #tpu.memory_space<vmem>>) attributes {dimension_semantics = [#tpu.dimension_semantics<parallel>, #tpu.dimension_semantics<arbitrary>], iteration_bounds = array<i64: 1, 1>, scalar_prefetch = 0 : i64, scratch_operands = 1 : i64, tpu.core_type = #tpu.core_type<tc>, window_params = [{transform_indices = @transform_0, window_bounds = array<i64: 16, 32>}, {transform_indices = @transform_1, window_bounds = array<i64: 32, 128>}, {transform_indices = @transform_2, window_bounds = array<i64: 128, 32>}, {pipeline_mode = #tpu.pipeline_mode<synchronous>, transform_indices = @transform_3, window_bounds = array<i64: 1, 32>}, {pipeline_mode = #tpu.pipeline_mode<synchronous>, transform_indices = @transform_4, window_bounds = array<i64: 1, 32>}, {transform_indices = @transform_5, window_bounds = array<i64: 16, 32>}]} {
    %c0_i32 = arith.constant 0 : i32
    %0 = arith.cmpi eq, %arg1, %c0_i32 : i32
    %1 = arith.extui %0 : i1 to i32
    %c0_i32_0 = arith.constant 0 : i32
    %2 = arith.cmpi ne, %1, %c0_i32_0 : i32
    scf.if %2 {
      %cst_14 = arith.constant 0.000000e+00 : f32
      %16 = vector.broadcast %cst_14 : f32 to vector<16x32xf32>
      %c0_15 = arith.constant 0 : index
      %c0_16 = arith.constant 0 : index
      %17 = vector.load %arg8[%c0_15, %c0_16] : memref<16x32xf32, #tpu.memory_space<vmem>>, vector<16x32xf32>
      tpu.vector_store %arg8[%c0_15, %c0_16], %16 {strides = array<i32>} : memref<16x32xf32, #tpu.memory_space<vmem>>, vector<16x32xf32>,
    } else {
    }
    %c0 = arith.constant 0 : index
    %c0_1 = arith.constant 0 : index
    %3 = vector.load %arg2[%c0, %c0_1] : memref<16x32xf32, #tpu.memory_space<vmem>>, vector<16x32xf32>
    %c0_2 = arith.constant 0 : index
    %c0_3 = arith.constant 0 : index
    %4 = vector.load %arg3[%c0_2, %c0_3] : memref<32x128xf32, #tpu.memory_space<vmem>>, vector<32x128xf32>
    %cst = arith.constant dense<0.000000e+00> : vector<16x128xf32>
    %5 = tpu.matmul %3, %4, %cst {dimension_numbers = #tpu.dot_dimension_numbers<[1], [0], [0], [1], [0, 0, 1, 1], [], []>} : vector<16x32xf32>, vector<32x128xf32>, vector<16x128xf32> -> vector<16x128xf32>
    %cst_4 = arith.constant 0.000000e+00 : f32
    %6 = vector.broadcast %cst_4 : f32 to vector<16x128xf32>
    %7 = arith.maximumf %5, %6 : vector<16x128xf32>
    %c0_5 = arith.constant 0 : index
    %c0_6 = arith.constant 0 : index
    %8 = vector.load %arg8[%c0_5, %c0_6] : memref<16x32xf32, #tpu.memory_space<vmem>>, vector<16x32xf32>
    %c0_7 = arith.constant 0 : index
    %c0_8 = arith.constant 0 : index
    %9 = vector.load %arg4[%c0_7, %c0_8] : memref<128x32xf32, #tpu.memory_space<vmem>>, vector<128x32xf32>
    %cst_9 = arith.constant dense<0.000000e+00> : vector<16x32xf32>
    %10 = tpu.matmul %7, %9, %cst_9 {dimension_numbers = #tpu.dot_dimension_numbers<[1], [0], [0], [1], [0, 0, 1, 1], [], []>} : vector<16x128xf32>, vector<128x32xf32>, vector<16x32xf32> -> vector<16x32xf32>
    %11 = arith.addf %8, %10 : vector<16x32xf32>
    %c0_10 = arith.constant 0 : index
    %c0_11 = arith.constant 0 : index
    %12 = vector.load %arg8[%c0_10, %c0_11] : memref<16x32xf32, #tpu.memory_space<vmem>>, vector<16x32xf32>
    tpu.vector_store %arg8[%c0_10, %c0_11], %11 {strides = array<i32>} : memref<16x32xf32, #tpu.memory_space<vmem>>, vector<16x32xf32>,
    %c0_i32_12 = arith.constant 0 : i32
    %13 = arith.cmpi eq, %arg1, %c0_i32_12 : i32
    %14 = arith.extui %13 : i1 to i32
    %c0_i32_13 = arith.constant 0 : i32
    %15 = arith.cmpi ne, %14, %c0_i32_13 : i32
    scf.if %15 {
      %c0_14 = arith.constant 0 : index
      %c0_15 = arith.constant 0 : index
      %16 = vector.load %arg8[%c0_14, %c0_15] : memref<16x32xf32, #tpu.memory_space<vmem>>, vector<16x32xf32>
      %17 = arith.addf %16, %3 : vector<16x32xf32>
      %cst_16 = arith.constant dense<0.000000e+00> : vector<16xf32>
      %18 = vector.multi_reduction <add>, %17, %cst_16 [1] : vector<16x32xf32> to vector<16xf32>
      %19 = vector.shape_cast %18 : vector<16xf32> to vector<16x1xf32>
      %cst_17 = arith.constant 3.200000e+01 : f32
      %20 = vector.broadcast %cst_17 : f32 to vector<16x1xf32>
      %21 = arith.divf %19, %20 : vector<16x1xf32>
      %22 = vector.broadcast %21 : vector<16x1xf32> to vector<16x32xf32>
      %23 = arith.subf %17, %22 : vector<16x32xf32>
      %24 = arith.mulf %23, %23 : vector<16x32xf32>
      %cst_18 = arith.constant dense<0.000000e+00> : vector<16xf32>
      %25 = vector.multi_reduction <add>, %24, %cst_18 [1] : vector<16x32xf32> to vector<16xf32>
      %26 = vector.shape_cast %25 : vector<16xf32> to vector<16x1xf32>
      %cst_19 = arith.constant 3.200000e+01 : f32
      %27 = vector.broadcast %cst_19 : f32 to vector<16x1xf32>
      %28 = arith.divf %26, %27 : vector<16x1xf32>
      %cst_20 = arith.constant 9.99999997E-7 : f32
      %29 = vector.broadcast %cst_20 : f32 to vector<16x1xf32>
      %30 = arith.addf %28, %29 : vector<16x1xf32>
      %31 = math.rsqrt %30 : vector<16x1xf32>
      %c0_21 = arith.constant 0 : index
      %c0_22 = arith.constant 0 : index
      %32 = vector.load %arg5[%c0_21, %c0_22] : memref<1x32xf32, #tpu.memory_space<vmem>>, vector<1x32xf32>
      %c0_23 = arith.constant 0 : index
      %c0_24 = arith.constant 0 : index
      %33 = vector.load %arg6[%c0_23, %c0_24] : memref<1x32xf32, #tpu.memory_space<vmem>>, vector<1x32xf32>
      %34 = vector.broadcast %31 : vector<16x1xf32> to vector<16x32xf32>
      %35 = arith.mulf %23, %34 : vector<16x32xf32>
      %36 = vector.broadcast %32 : vector<1x32xf32> to vector<16x32xf32>
      %37 = arith.mulf %35, %36 : vector<16x32xf32>
      %38 = vector.broadcast %33 : vector<1x32xf32> to vector<16x32xf32>
      %39 = arith.addf %37, %38 : vector<16x32xf32>
      %c0_25 = arith.constant 0 : index
      %c0_26 = arith.constant 0 : index
      %40 = vector.load %arg7[%c0_25, %c0_26] : memref<16x32xf32, #tpu.memory_space<vmem>>, vector<16x32xf32>
      tpu.vector_store %arg7[%c0_25, %c0_26], %39 {strides = array<i32>} : memref<16x32xf32, #tpu.memory_space<vmem>>, vector<16x32xf32>,
    } else {
    }
    return
  }
  func.func @transform_0(%arg0: i32, %arg1: i32) -> (i32, i32) {
    %c0_i32 = arith.constant 0 : i32
    %c0_i32_0 = arith.constant 0 : i32
    return %arg0, %c0_i32 : i32, i32
  }
  func.func @transform_1(%arg0: i32, %arg1: i32) -> (i32, i32) {
    %c0_i32 = arith.constant 0 : i32
    %c0_i32_0 = arith.constant 0 : i32
    return %c0_i32, %arg1 : i32, i32
  }
  func.func @transform_2(%arg0: i32, %arg1: i32) -> (i32, i32) {
    %c0_i32 = arith.constant 0 : i32
    %c0_i32_0 = arith.constant 0 : i32
    return %arg1, %c0_i32 : i32, i32
  }
  func.func @transform_3(%arg0: i32, %arg1: i32) -> (i32, i32) {
    %c0_i32 = arith.constant 0 : i32
    %c0_i32_0 = arith.constant 0 : i32
    %c0_i32_1 = arith.constant 0 : i32
    return %c0_i32, %c0_i32_0 : i32, i32
  }
  func.func @transform_4(%arg0: i32, %arg1: i32) -> (i32, i32) {
    %c0_i32 = arith.constant 0 : i32
    %c0_i32_0 = arith.constant 0 : i32
    %c0_i32_1 = arith.constant 0 : i32
    return %c0_i32, %c0_i32_0 : i32, i32
  }
  func.func @transform_5(%arg0: i32, %arg1: i32) -> (i32, i32) {
    %c0_i32 = arith.constant 0 : i32
    %c0_i32_0 = arith.constant 0 : i32
    return %arg0, %c0_i32 : i32, i32
  }
}

</mosaic_0001>

<bundles_post_ra>
// kernel: tpu_custom_call.1
= control target key start
LH: loop header
LB: loop body
LE: loop exit
PB: predicated region body
PF: predicated region fallthrough
CT: control target
= control target key end

     0   :  { %vm25_vm0 = vcmask 261120   ;;  %s518_s0 = inlined_call_operand.vmem [shape: f32[16,32], index: 0, kind: input, shape index: {}]   ;;  %s519_s1 = inlined_call_operand.vmem [shape: f32[32,128], index: 1, kind: input, shape index: {}]   ;;  %s520_s2 = inlined_call_operand.vmem [shape: f32[128,32], index: 2, kind: input, shape index: {}]   ;;  %s521_s3 = inlined_call_operand.vmem [shape: f32[1,32], index: 3, kind: input, shape index: {}]   ;;  %s522_s4 = inlined_call_operand.vmem [shape: f32[1,32], index: 4, kind: input, shape index: {}]   ;;  %s523_s5 = inlined_call_operand.hbm [shape: f32[16,32], index: 5, kind: output, shape index: {}]  }
   0x1   :  { %v33_v0 = vld [vmem:[%s519_s1 + $0x18] sm:$0xff]  ;;  %v32_v1 = vld [vmem:[%s519_s1 + $0x10] sm:$0xff]  ;;  %v432_v2 = vld [vmem:[%s518_s0] sm:$0xff] }
   0x2   :  { %313 = vmatprep.subr.mxu0 %v33_v0  ;;  %v31_v3 = vld [vmem:[%s519_s1 + $0x8] sm:$0xff]  ;;  %321 = vmatprep.mubr.msk.f32.mxu0 %vm25_vm0, %v432_v2  ;;  %v135_v4 = vld [vmem:[%s520_s2 + $0x78] sm:$0xff]  ;;  %v134_v5 = vld [vmem:[%s520_s2 + $0x70] sm:$0xff] }
   0x3   :  { %314 = vmatpush3.msra.mxu0 %v33_v0  ;;  %324 = vmatprep.subr.mxu1 %v135_v4  ;;  %v30_v6 = vld [vmem:[%s519_s1] sm:$0xff]  ;;  %v133_v7 = vld [vmem:[%s520_s2 + $0x68] sm:$0xff] }
   0x4   :  { %315 = vmatprep.subr.mxu0 %v32_v1  ;;  %325 = vmatpush3.msra.mxu1 %v135_v4  ;;  %v454_v8 = vld [vmem:[%s518_s0 + $0x8] sm:$0xff]  ;;  %v132_v9 = vld [vmem:[%s520_s2 + $0x60] sm:$0xff] }
   0x5   :  { %316 = vmatpush3.msra.mxu0 %v32_v1  ;;  %326 = vmatprep.subr.mxu1 %v134_v5 }
   0x6   :  { %317 = vmatprep.subr.mxu0 %v31_v3  ;;  %327 = vmatpush3.msra.mxu1 %v134_v5 }
   0x7   :  { %318 = vmatpush3.msra.mxu0 %v31_v3 }
   0x8   :  { %10 = vsyncpa [#allocation4], 0  ;;  %319 = vmatprep.subr.mxu0 %v30_v6  ;;  %328 = vmatprep.subr.mxu1 %v133_v7  ;;  %v131_v10 = vld [vmem:[%s520_s2 + $0x58] sm:$0xff]  ;;  %v130_v11 = vld [vmem:[%s520_s2 + $0x50] sm:$0xff]  ;;  %v389_v22 = vmov 0.0   ;;  %s390_s1 = smov [#allocation3]  }
   0x9   :  { %320 = vmatpush3.msra.mxu0 %v30_v6  ;;  %329 = vmatpush3.msra.mxu1 %v133_v7  ;;  %v129_v12 = vld [vmem:[%s520_s2 + $0x48] sm:$0xff]  ;;  %v128_v13 = vld [vmem:[%s520_s2 + $0x40] sm:$0xff]  ;;  %v127_v14 = vld [vmem:[%s520_s2 + $0x38] sm:$0xff]  ;;  %27 = vst.msk [vmem:[#allocation2 + $0x8] sm:$0xff] %vm25_vm0, %v389_v22  ;;  %s274_s13 = sshll.u32 %s390_s1, 4  ;;  %s275_s13 = int_to_ptr.vmem [resolvable:$true] %s274_s13 }
   0xa   :  { %322 = vmatmul.mubr.msk.f32.vlgmr.msra.gmra.mxu0 %vm25_vm0, %v454_v8  ;;  %330 = vmatprep.subr.mxu1 %v132_v9  ;;  %v126_v15 = vld [vmem:[%s520_s2 + $0x30] sm:$0xff]  ;;  %v125_v16 = vld [vmem:[%s520_s2 + $0x28] sm:$0xff]  ;;  %v124_v17 = vld [vmem:[%s520_s2 + $0x20] sm:$0xff]  ;;  %26 = vst.msk [vmem:[#allocation2] sm:$0xff] %vm25_vm0, %v389_v22  ;;  %s367_s0 = scalar_lea.vmem %s275_s13, 256  ;;  %p372_p1 = scmp.lt.s32.totalorder %s275_s13, %s275_s13 }
   0xb   :  { %331 = vmatpush3.msra.mxu1 %v132_v9  ;;  %v123_v18 = vld [vmem:[%s520_s2 + $0x18] sm:$0xff]  ;;  %v122_v19 = vld [vmem:[%s520_s2 + $0x10] sm:$0xff]  ;;  %v121_v20 = vld [vmem:[%s520_s2 + $0x8] sm:$0xff]  ;;  %p368_p0 = scmp.ne.s32.totalorder %s275_s13, %s367_s0  ;;  %p373_p2 = scmp.lt.s32.totalorder %s367_s0, %s367_s0 }
   0xc   :  { %332 = vmatprep.subr.mxu1 %v131_v10  ;;  %v120_v21 = vld [vmem:[%s520_s2] sm:$0xff] }
   0xd   :  { %333 = vmatpush3.msra.mxu1 %v131_v10  ;;  %v287_v56 = vld [vmem:[%s521_s3] ss:$0 sm:$0xff]  ;;  %p374_p3 = por %p373_p2, %p372_p1 }
   0xe   :  { %334 = vmatprep.subr.mxu1 %v130_v11  ;;  %v288_v58 = vld [vmem:[%s522_s4] ss:$0 sm:$0xff] }
   0xf   :  { %335 = vmatpush3.msra.mxu1 %v130_v11  ;;  %p375_p4 = pnand %p374_p3, %p368_p0 }
  0x10   :  { %336 = vmatprep.subr.mxu1 %v129_v12  ;;  %v119_v27 = vld [vmem:[#allocation2 + $0x8] sm:$0xff] }
  0x11   :  { %337 = vmatpush3.msra.mxu1 %v129_v12  ;;  %v118_v29 = vld [vmem:[#allocation2] sm:$0xff] }
  0x12   :  { %338 = vmatprep.subr.mxu1 %v128_v13 }
  0x13   :  { %339 = vmatpush3.msra.mxu1 %v128_v13 }
  0x14   :  { %340 = vmatprep.subr.mxu1 %v127_v14 }
  0x15   :  { %341 = vmatpush3.msra.mxu1 %v127_v14 }
  0x16   :  { %342 = vmatprep.subr.mxu1 %v126_v15 }
  0x17   :  { %343 = vmatpush3.msra.mxu1 %v126_v15 }
  0x18   :  { %344 = vmatprep.subr.mxu1 %v125_v16 }
  0x19   :  { %345 = vmatpush3.msra.mxu1 %v125_v16 }
  0x1a   :  { %346 = vmatprep.subr.mxu1 %v124_v17 }
  0x1b   :  { %347 = vmatpush3.msra.mxu1 %v124_v17 }
  0x1c   :  { %348 = vmatprep.subr.mxu1 %v123_v18 }
  0x1d   :  { %349 = vmatpush3.msra.mxu1 %v123_v18 }
  0x1e   :  { %350 = vmatprep.subr.mxu1 %v122_v19 }
  0x1f   :  { %351 = vmatpush3.msra.mxu1 %v122_v19 }
  0x20   :  { %352 = vmatprep.subr.mxu1 %v121_v20 }
  0x21   :  { %353 = vmatpush3.msra.mxu1 %v121_v20 }
  0x22   :  { %354 = vmatprep.subr.mxu1 %v120_v21 }
  0x23   :  { %355 = vmatpush3.msra.mxu1 %v120_v21 }
  0xca   :  { %v323_v23 = vpop.f32.mrf.mxu0 }
  0xcb   :  { %v117_v26 = vmax.f32 %v323_v23, 0.0 }
  0xcc   :  { %v107_v24 = vpop.f32.mrf.mxu0 }
  0xcd   :  { %v116_v25 = vmax.f32 %v107_v24, 0.0 }
  0xcf   :  { %356 = vmatprep.mubr.f32.mxu1 %v116_v25 }
  0xd0   :  { %357 = vmatmul.mubr.f32.vlgmr.msra.gmra.mxu1 %v117_v26 }
 0x190   :  { %v358_v28 = vpop.f32.mrf.mxu1 }
 0x191   :  { %v212_v30 = vadd.f32 %v358_v28, %v119_v27 }
 0x192   :  { %v202_v31 = vpop.f32.mrf.mxu1 }
 0x193   :  { %214 = vst.msk [vmem:[#allocation2 + $0x8] sm:$0xff] %vm25_vm0, %v212_v30  ;;  %v211_v32 = vadd.f32 %v202_v31, %v118_v29 }
 0x195   :  { %213 = vst.msk [vmem:[#allocation2] sm:$0xff] %vm25_vm0, %v211_v32 }
 0x19a   :  { %v219_v34 = vld [vmem:[#allocation2 + $0x8] sm:$0xff] }
 0x19b   :  { %v221_v37 = vadd.f32 %v219_v34, %v454_v8 }
 0x19c   :  { %v218_v33 = vld [vmem:[#allocation2] sm:$0xff] }
 0x19d   :  { %v220_v35 = vadd.f32 %v218_v33, %v432_v2  ;;  %v225_v38 = vsel %vm25_vm0, %v221_v37, 0.0 }
 0x19f   :  { %v222_v36 = vsel %vm25_vm0, %v220_v35, 0.0 }
 0x1a0   :  { %223 = vadd.xlane.f32.xlu0 %v222_v36 }
 0x1a4   :  { %226 = vadd.xlane.f32.xlu0 %v225_v38 }
 0x229   :  { %v224_v39 = vpop.xlane.xlu0 %223 }
 0x22a   :  { %v229_v40 = vmul.f32 0.03125, %v224_v39 }
 0x22c   :  { %v231_v41 = vsub.f32 %v220_v35, %v229_v40 }
 0x22d   :  { %v227_v42 = vpop.xlane.xlu0 %226 }
 0x22e   :  { %v230_v43 = vmul.f32 0.03125, %v227_v42  ;;  %v233_v44 = vmul.f32 %v231_v41, %v231_v41 }
 0x230   :  { %v232_v45 = vsub.f32 %v221_v37, %v230_v43  ;;  %v235_v46 = vsel %vm25_vm0, %v233_v44, 0.0 }
 0x231   :  { %236 = vadd.xlane.f32.xlu1 %v235_v46 }
 0x232   :  { %v234_v47 = vmul.f32 %v232_v45, %v232_v45 }
 0x234   :  { %v238_v48 = vsel %vm25_vm0, %v234_v47, 0.0 }
 0x235   :  { %239 = vadd.xlane.f32.xlu1 %v238_v48 }
 0x2ba   :  { %v237_v49 = vpop.xlane.xlu1 %236 }
 0x2bb   :  { %v241_v50 = vmul.f32 0.03125, %v237_v49 }
 0x2bd   :  { %v243_v51 = vadd.f32 1e-06, %v241_v50 }
 0x2be   :  { %v240_v52 = vpop.xlane.xlu1 %239 }
 0x2bf   :  { %363 = vrsqrt.f32 %v243_v51  ;;  %v242_v53 = vmul.f32 0.03125, %v240_v52 }
 0x2c1   :  { %v244_v54 = vadd.f32 1e-06, %v242_v53 }
 0x2c3   :  { %365 = vrsqrt.f32 %v244_v54 }
 0x2cc   :  { %v364_v55 = vpop.eup %363 }
 0x2cd   :  { %v249_v57 = vmul.f32 %v364_v55, %v231_v41 }
 0x2cf   :  { %v257_v59 = vmul.f32 %v287_v56, %v249_v57 }
 0x2d0   :  { %v366_v60 = vpop.eup %365 }
 0x2d1   :  { %v250_v61 = vmul.f32 %v366_v60, %v232_v45  ;;  %v265_v62 = vadd.f32 %v288_v58, %v257_v59 }
 0x2d3   :  { %v258_v63 = vmul.f32 %v287_v56, %v250_v61  ;;  %267 = vst.msk [vmem:[#allocation3] sm:$0xff] %vm25_vm0, %v265_v62 }
 0x2d5   :  { %v266_v0 = vadd.f32 %v288_v58, %v258_v63 }
 0x2d7   :  { %268 = vst.msk [vmem:[#allocation3 + $0x8] sm:$0xff] %vm25_vm0, %v266_v0 }
 0x2d8   :  { %378 = shalt.err (!%p375_p4)
}
 0x2d9   :  { %s391_s3 = smov 128   ;;  %s392_s4 = smov 8  }
 0x2da   :  { %280 = dma.vmem_to_hbm [thread:$0]  %s275_s13, 256, %s523_s5, [#allocation4], %s391_s3, %s391_s3, %s392_s4  }
 0x2db   :  { %387 = dma.done.wait [#allocation4], 256  }
 0x2dc   :  { %388 = vsyncadd [#allocation4], 4294967040 }
 0x2dd   :  { %284 = vsyncpa [#allocation4], 1 }

</bundles_post_ra>
